<compile_context>
chip_gen: v6e
topology: v6e:2x2x1
jax: 0.10.0
libtpu: 0.0.40
codegen_flags: <defaults>
</compile_context>

<pallas_src>
import functools

import jax
import jax.numpy as jnp
from jax.experimental import pallas as pl
from jax.experimental.pallas import tpu as pltpu


# --------------------------------------------------------------------------- #
# Stage 1: spatial sum reduction (HBM-bound hot loop).
# --------------------------------------------------------------------------- #
def _pooled_sum_kernel(x_ref, psum_ref, *, hw_tile, true_hw, steps_per_split,
                       mask_tail):
    # x_ref:    (n_tile, C, hw_tile)  one spatial chunk, native dtype
    # psum_ref: (1, n_tile, C) f32    partial sum, resident across the k axis
    k = pl.program_id(2)

    @pl.when(k == 0)
    def _init():
        psum_ref[...] = jnp.zeros_like(psum_ref)

    x = x_ref[...]
    if mask_tail:  # static Python flag: only emitted when HW % hw_tile != 0
        s = pl.program_id(1)
        start = (s * steps_per_split + k) * hw_tile
        offs = start + jax.lax.broadcasted_iota(jnp.int32, x.shape, x.ndim - 1)
        x = jnp.where(offs < true_hw, x, jnp.zeros_like(x))

    # Hot path: pure DMA + add-reduce, f32 accumulation over native-dtype data.
    psum_ref[...] += jnp.sum(x, axis=-1, dtype=jnp.float32)[None, :, :]


# --------------------------------------------------------------------------- #
# Stage 2: combine partial sums, scale by 1/(H*W), 2-layer 1x1-conv MLP.
# Runs once on tiny (hw_split, N, C) data.
# --------------------------------------------------------------------------- #
def _ca_mlp_kernel(psum_ref, w1t_ref, b1_ref, w2t_ref, b2_ref, o_ref, *, inv_hw):
    pooled = jnp.sum(psum_ref[...], axis=0) * inv_hw                  # (N, C)
    h = jnp.dot(pooled, w1t_ref[...].astype(jnp.float32),
                preferred_element_type=jnp.float32)
    h = jnp.maximum(h + b1_ref[...].astype(jnp.float32), 0.0)         # (N, C//r)
    out = jnp.dot(h, w2t_ref[...].astype(jnp.float32),
                  preferred_element_type=jnp.float32)
    out = out + b2_ref[...].astype(jnp.float32)                       # (N, C)
    o_ref[...] = out.astype(o_ref.dtype)


def _vmem_budgets():
    """Generation-aware (physical VMEM-based) per-step block budgets."""
    vmem_cap = 64 * 1024 * 1024                      # conservative (v7x) default
    try:
        vmem_cap = int(pltpu.get_tpu_info().vmem_capacity_bytes)
    except Exception:
        pass
    if vmem_cap <= 64 * 1024 * 1024:
        # v7x-class: 64 MiB physical VMEM, very fast HBM -> need >=~4 MiB/step
        # to amortize step overhead, but keep the double buffer well under cap.
        max_block, min_block = 8 * 1024 * 1024, 4 * 1024 * 1024
    else:
        # v5e / v6e class: 128 MiB physical VMEM, slower HBM.
        max_block, min_block = 12 * 1024 * 1024, 2 * 1024 * 1024
    return vmem_cap, max_block, min_block


def channel_attention(x, w1, b1, w2, b2, *, hw_tile=None):
    """x: (N, C, H, W).  w1: (C//r, C), b1: (C//r,), w2: (C, C//r), b2: (C,).
    Returns cattn of shape (N, C, 1, 1) (the module returns cattn, NOT x*cattn)."""
    N, C, H, W = x.shape
    Cr = w1.shape[0]
    HW = H * W
    itemsize = jnp.dtype(x.dtype).itemsize

    x_flat = x.reshape(N, C, HW)

    vmem_cap, max_block, min_block = _vmem_budgets()

    # ---- batch tiling: give the leading "parallel" axis >= 2 blocks when the
    # batch is large enough (blocks are multiples of 8; the ragged tail block's
    # extra rows are clipped on writeback since the computation is row-wise).
    if N >= 16:
        n_tile = max(8, ((N + 1) // 2) // 8 * 8)
    else:
        n_tile = N
    # Keep even a minimal 128-wide spatial slab of this batch block within budget.
    while n_tile > 8 and n_tile * C * itemsize * 128 > max_block:
        n_tile = max(8, (n_tile // 2 + 7) // 8 * 8)
    num_n = pl.cdiv(N, n_tile)

    # ---- spatial tiling: biggest lane-aligned tile within the per-step budget.
    row_bytes = n_tile * C * itemsize
    if hw_tile is None:
        budget_tile = (max_block // row_bytes) // 128 * 128
        if HW <= 128 or budget_tile >= HW:
            hw_tile = HW                      # single full-extent spatial block
        else:
            hw_tile = max(128, budget_tile)
    hw_tile = min(hw_tile, HW)                # never an oversized block
    num_hw_blocks = pl.cdiv(HW, hw_tile)
    mask_tail = (HW % hw_tile) != 0           # ragged tail handled in-kernel

    # ---- split the spatial reduction across a second parallel axis when the
    # batch alone cannot feed v7x's second TensorCore.
    hw_split = 2 if (num_n == 1 and num_hw_blocks >= 2
                     and num_hw_blocks % 2 == 0) else 1
    steps_per_split = num_hw_blocks // hw_split
    total_steps = num_n * hw_split * steps_per_split

    block_bytes = row_bytes * hw_tile
    buffer_count = 3 if (block_bytes < min_block and total_steps >= 3) else 2
    vmem_limit = int(min(vmem_cap,
                         max(32 * 1024 * 1024,
                             buffer_count * block_bytes + 4 * 1024 * 1024)))

    x_index_map = lambda n, s, k: (n, 0, s * steps_per_split + k)
    if buffer_count == 2:
        x_spec = pl.BlockSpec((n_tile, C, hw_tile), x_index_map)
    else:
        x_spec = pl.BlockSpec((n_tile, C, hw_tile), x_index_map,
                              pipeline_mode=pl.Buffered(buffer_count))

    kernel1 = functools.partial(_pooled_sum_kernel, hw_tile=hw_tile, true_hw=HW,
                                steps_per_split=steps_per_split,
                                mask_tail=mask_tail)

    cost = pl.CostEstimate(
        flops=int(N * C * HW),
        transcendentals=0,
        bytes_accessed=int(N * C * HW * itemsize + hw_split * N * C * 4))

    psum = pl.pallas_call(
        kernel1,
        out_shape=jax.ShapeDtypeStruct((hw_split, N, C), jnp.float32),
        grid_spec=pltpu.PrefetchScalarGridSpec(
            num_scalar_prefetch=0,
            grid=(num_n, hw_split, steps_per_split),     # reduction axis last
            in_specs=[x_spec],
            out_specs=pl.BlockSpec((1, n_tile, C), lambda n, s, k: (s, n, 0)),
        ),
        compiler_params=pltpu.CompilerParams(
            dimension_semantics=("parallel", "parallel", "arbitrary"),
            vmem_limit_bytes=vmem_limit),
        cost_estimate=cost,
    )(x_flat)

    # ---- tiny finalize kernel: combine splits, mean, MLP (runs once).
    w1t = jnp.transpose(w1)          # (C, Cr)
    w2t = jnp.transpose(w2)          # (Cr, C)
    b1_2d = b1.reshape(1, Cr)
    b2_2d = b2.reshape(1, C)

    kernel2 = functools.partial(_ca_mlp_kernel, inv_hw=float(1.0 / HW))
    out = pl.pallas_call(
        kernel2,
        out_shape=jax.ShapeDtypeStruct((N, C), x.dtype),
    )(psum, w1t, b1_2d, w2t, b2_2d)

    return out.reshape(N, C, 1, 1)


def _reference(x, w1, b1, w2, b2):
    pooled = jnp.mean(x.astype(jnp.float32), axis=(2, 3))          # (N, C)
    h = jnp.maximum(pooled @ w1.T + b1, 0.0)                       # (N, C//r)
    out = h @ w2.T + b2                                            # (N, C)
    return out.reshape(x.shape[0], x.shape[1], 1, 1)


if __name__ == "__main__":
    # Module config: dim=16, reduction=8 -> hidden = 2
    dim = 16
    reduction = 8
    hidden = dim // reduction
    N = 2

    key = jax.random.PRNGKey(0)
    kx, k1, k2, k3, k4, kx2, kx3 = jax.random.split(key, 7)

    # Conv2d(dim, dim//r, 1) / Conv2d(dim//r, dim, 1) weights with the trailing
    # 1x1 kernel dims squeezed.
    w1 = jax.random.normal(k1, (hidden, dim), dtype=jnp.float32) * 0.1   # (C//r, C)
    b1 = jax.random.normal(k2, (hidden,), dtype=jnp.float32) * 0.1
    w2 = jax.random.normal(k3, (dim, hidden), dtype=jnp.float32) * 0.1   # (C, C//r)
    b2 = jax.random.normal(k4, (dim,), dtype=jnp.float32) * 0.1

    # 1) Main case (H=W=16).  Forced hw_tile=128 -> 2 spatial blocks, split
    #    across the parallel hw axis (exercises the split + combine path).
    x = jax.random.normal(kx, (N, dim, 16, 16), dtype=jnp.float32)
    out = jax.block_until_ready(channel_attention(x, w1, b1, w2, b2, hw_tile=128))
    ref = _reference(x, w1, b1, w2, b2)
    assert out.shape == (N, dim, 1, 1)
    assert jnp.allclose(out, ref, atol=1e-5, rtol=1e-5)

    # 2) Ragged spatial size (H=W=13 -> HW=169): exercises the in-kernel
    #    iota tail mask on a partial boundary block (no wrapper-side padding).
    x_r = jax.random.normal(kx2, (N, dim, 13, 13), dtype=jnp.float32)
    out_r = jax.block_until_ready(channel_attention(x_r, w1, b1, w2, b2, hw_tile=128))
    ref_r = _reference(x_r, w1, b1, w2, b2)
    assert jnp.allclose(out_r, ref_r, atol=1e-5, rtol=1e-5)

    # 3) Multi-step accumulation (H=W=32 -> 8 blocks of 128): exercises the
    #    resident-accumulator loop and the Buffered(3) small-block path.
    x_m = jax.random.normal(kx3, (N, dim, 32, 32), dtype=jnp.float32)
    out_m = jax.block_until_ready(channel_attention(x_m, w1, b1, w2, b2, hw_tile=128))
    ref_m = _reference(x_m, w1, b1, w2, b2)
    assert jnp.allclose(out_m, ref_m, atol=1e-5, rtol=1e-5)

    # 4) bf16 input with auto tile selection: half the HBM traffic, f32
    #    accumulation inside the kernel.
    out_bf16 = jax.block_until_ready(
        channel_attention(x.astype(jnp.bfloat16), w1, b1, w2, b2))
    assert out_bf16.shape == (N, dim, 1, 1)
    assert jnp.allclose(out_bf16.astype(jnp.float32), ref, atol=5e-2, rtol=5e-2)

    print("KERNEL_OK")
</pallas_src>

<mosaic_0001>
module attributes {stable_mosaic.version = 11 : i64} {
  func.func @_pooled_sum_kernel(%arg0: i32, %arg1: i32, %arg2: i32, %arg3: memref<2x16x128xf32, #tpu.memory_space<vmem>>, %arg4: memref<1x2x16xf32, #tpu.memory_space<vmem>>) attributes {dimension_semantics = [#tpu.dimension_semantics<parallel>, #tpu.dimension_semantics<parallel>, #tpu.dimension_semantics<arbitrary>], iteration_bounds = array<i64: 1, 2, 1>, scalar_prefetch = 0 : i64, scratch_operands = 0 : i64, tpu.core_type = #tpu.core_type<tc>, window_params = [{transform_indices = @transform_0, window_bounds = array<i64: 2, 16, 128>}, {transform_indices = @transform_1, window_bounds = array<i64: 1, 2, 16>}]} {
    %c0_i32 = arith.constant 0 : i32
    %0 = arith.cmpi eq, %arg2, %c0_i32 : i32
    %1 = arith.extui %0 : i1 to i32
    %c0_i32_0 = arith.constant 0 : i32
    %2 = arith.cmpi ne, %1, %c0_i32_0 : i32
    scf.if %2 {
      %cst_9 = arith.constant 0.000000e+00 : f32
      %9 = vector.broadcast %cst_9 : f32 to vector<1x2x16xf32>
      %c0_10 = arith.constant 0 : index
      %c0_11 = arith.constant 0 : index
      %c0_12 = arith.constant 0 : index
      %10 = vector.load %arg4[%c0_10, %c0_11, %c0_12] : memref<1x2x16xf32, #tpu.memory_space<vmem>>, vector<1x2x16xf32>
      tpu.vector_store %arg4[%c0_10, %c0_11, %c0_12], %9 {strides = array<i32>} : memref<1x2x16xf32, #tpu.memory_space<vmem>>, vector<1x2x16xf32>,
    } else {
    }
    %c0 = arith.constant 0 : index
    %c0_1 = arith.constant 0 : index
    %c0_2 = arith.constant 0 : index
    %3 = vector.load %arg3[%c0, %c0_1, %c0_2] : memref<2x16x128xf32, #tpu.memory_space<vmem>>, vector<2x16x128xf32>
    %c0_3 = arith.constant 0 : index
    %c0_4 = arith.constant 0 : index
    %c0_5 = arith.constant 0 : index
    %4 = vector.load %arg4[%c0_3, %c0_4, %c0_5] : memref<1x2x16xf32, #tpu.memory_space<vmem>>, vector<1x2x16xf32>
    %cst = arith.constant dense<0.000000e+00> : vector<2x16xf32>
    %5 = vector.multi_reduction <add>, %3, %cst [2] : vector<2x16x128xf32> to vector<2x16xf32>
    %6 = vector.shape_cast %5 : vector<2x16xf32> to vector<1x2x16xf32>
    %7 = arith.addf %4, %6 : vector<1x2x16xf32>
    %c0_6 = arith.constant 0 : index
    %c0_7 = arith.constant 0 : index
    %c0_8 = arith.constant 0 : index
    %8 = vector.load %arg4[%c0_6, %c0_7, %c0_8] : memref<1x2x16xf32, #tpu.memory_space<vmem>>, vector<1x2x16xf32>
    tpu.vector_store %arg4[%c0_6, %c0_7, %c0_8], %7 {strides = array<i32>} : memref<1x2x16xf32, #tpu.memory_space<vmem>>, vector<1x2x16xf32>,
    return
  }
  func.func @transform_0(%arg0: i32, %arg1: i32, %arg2: i32) -> (i32, i32, i32) {
    %c1_i32 = arith.constant 1 : i32
    %0 = arith.muli %arg1, %c1_i32 : i32
    %1 = arith.addi %0, %arg2 : i32
    %c0_i32 = arith.constant 0 : i32
    %c0_i32_0 = arith.constant 0 : i32
    return %arg0, %c0_i32, %1 : i32, i32, i32
  }
  func.func @transform_1(%arg0: i32, %arg1: i32, %arg2: i32) -> (i32, i32, i32) {
    %c0_i32 = arith.constant 0 : i32
    %c0_i32_0 = arith.constant 0 : i32
    return %arg1, %arg0, %c0_i32 : i32, i32, i32
  }
}

</mosaic_0001>

<bundles_post_ra>
// kernel: tpu_custom_call.1
= control target key start
LH: loop header
LB: loop body
LE: loop exit
PB: predicated region body
PF: predicated region fallthrough
CT: control target
= control target key end

     0   :  { %6 = vsyncpa [#allocation3], 0  ;;  %s654_s0 = inlined_call_operand.hbm [shape: f32[2,16,256], index: 0, kind: input, shape index: {}]   ;;  %s655_s1 = inlined_call_operand.hbm [shape: f32[2,2,16], index: 1, kind: output, shape index: {}]  }
   0x1   :  { %8 = vsyncpa [#allocation3 + $0x1], 0 }
   0x2   :  { %9 = vsyncpa [#allocation4], 0 }
   0x3   :  { %11 = vsyncpa [#allocation4 + $0x1], 0  ;;  %s521_s6 = smov 0   ;;  %s523_s7 = smov 0  }
   0x4   :  { %s525_s8 = smov 0   ;;  %s527_s9 = smov 0  }
   0x5   :  { %s529_s10 = smov 0   ;;  %s531_s11 = smov 0  }
   0x6 LB: > { %s316_s12 = sadd.s32 4294967295, %s503_s11   ;;  %s317_s13 = sadd.s32 4294967294, %s503_s11   ;;  %s503_s11 = sphi %s531_s11, %s17_s11   ;;  %s499_s10 = sphi %s529_s10, %s666_s10   ;;  %s495_s9 = sphi %s527_s9, %s665_s9   ;;  %s491_s8 = sphi %s525_s8, %s664_s8   ;;  %s487_s7 = sphi %s523_s7, %s663_s7   ;;  %s483_s6 = sphi %s521_s6, %s662_s6  }
   0x7   : > { %s32_s14 = sadd.s32 1, %s499_s10  ;;  %s47_s15 = sadd.s32 1, %s491_s8 }
   0x8   : > { %p34_p0 = scmp.ge.s32.totalorder %s32_s14, 2  ;;  %p54_p1 = scmp.ne.s32.totalorder %s491_s8, %s487_s7 }
   0x9   : > { %p55_p2 = scmp.eq.s32.totalorder %s503_s11, 0  ;;  %p60_p3 = scmp.ne.s32.totalorder %s487_s7, %s483_s6 }
   0xa   : > { %s668_s14 = smov (%p34_p0, %s32_s14), 0  ;;  %p61_p5 = scmp.eq.s32.totalorder %s316_s12, 0 }
   0xb   : > { %p562_p4 = por %p55_p2, %p54_p1  ;;  %s43_s17 = ssub.s32 %s499_s10, %s668_s14 }
   0xc   : > { %p86_p6 = scmp.eq.s32.totalorder %s316_s12, 1  ;;  %p45_p7 = scmp.eq.s32.totalorder %s43_s17, 0 }
   0xd   : > { %p568_p8 = por %p61_p5, %p60_p3  ;;  %p92_p10 = scmp.eq.s32.totalorder %s317_s13, 1 }
   0xe   : > { %p572_p9 = por %p86_p6, %p54_p1  ;;  %p341_p13 = scmp.lt.s32.totalorder %s503_s11, 2 }
   0xf   : > { %s577_s20 = scalar_select %p45_p7, %s491_s8, %s47_s15  }
  0x10   : > { %p579_p11 = por %p92_p10, %p60_p3  ;;  %s112_s22 = sand.u32 1, %s491_s8  }
  0x11   : > { %s320_s23 = sshll.u32 %s112_s22, 5  ;;  %s321_s24 = sshll.u32 %s499_s10, 7 }
  0x12   : > { %s125_s27 = scalar_lea.hbm %s654_s0, %s321_s24  ;;  %s116_s28 = scalar_lea.vmem [#allocation2], %s320_s23 }
  0x13   : > { %s126_s29 = sshll.u32 %s116_s28, 4  ;;  %p592_p0 = pnand %p341_p13, %p562_p4  ;;  %s127_s29 = int_to_ptr.vmem [resolvable:$true] %s126_s29 }
  0x14   : > { %s113_s2 = scalar_lea.sflag [#allocation3], %s112_s22  ;;  %s408_s3 = scalar_lea.vmem %s127_s29, 512 }
  0x15   : > { %p397_p1 = pneg %p592_p0  ;;  %p409_p2 = scmp.ne.s32.totalorder %s127_s29, %s408_s3 }
  0x16   : > { %s505_s4 = smov [#allocation2]  }
  0x17   : > { %p411_p3 = pnand %p409_p2, %p397_p1  ;;  %s413_s5 = sshll.u32 %s505_s4, 4  ;;  %s414_s5 = int_to_ptr.vmem [resolvable:$false] %s413_s5 }
  0x18   : > { %s415_s12 = scalar_lea.vmem %s414_s5, 1024  ;;  %p416_p6 = scmp.lt.s32.totalorder %s127_s29, %s414_s5 }
  0x19   : > { %p412_p5 = pneg %p411_p3  ;;  %p417_p7 = scmp.lt.s32.totalorder %s415_s12, %s408_s3 }
  0x1b   : > { %p418_p10 = por %p417_p7, %p416_p6 }
  0x1d   : > { %p419_p12 = pnand %p418_p10, %p412_p5 }
  0x1f   : > { %422 = shalt.err (!%p419_p12)
}
  0x20   : > { %s506_s13 = smov 256   ;;  %s507_s15 = smov 128  }
  0x21   : > { %s508_s16 = smov 8   ;;  %p322_p4 = scmp.ge.s32.totalorder %s503_s11, 1 }
  0x22   : > { %336 = dma.hbm_to_vmem [thread:$0]  (!%p592_p0), %s125_s27, 512, %s127_s29, %s113_s2, %s506_s13, %s507_s15, %s508_s16  }
  0x23   : > { %p134_p13 = scmp.lt.s32.totalorder %s503_s11, 3 }
  0x25   : > { %p135_p1 = pnand %p322_p4, %p134_p13 }
  0x26   : > { %s603_s17 = sand.u32 (!%p135_p1), 1, %s487_s7  }
  0x27   : > { %138 = sbr.rel (%p135_p1) target bundleno = 207 (0xcf), region = 24  ;;  %s323_s22 = sshll.u32 (!%p135_p1), %s603_s17, 5 }
  0x28   : > { %s141_s23 = scalar_lea.sflag (!%p135_p1), [#allocation3], %s603_s17  ;;  %s144_s24 = scalar_lea.vmem (!%p135_p1), [#allocation2], %s323_s22 }
  0x2c   : > { %474 = dma.done.wait (%p568_p8), %s141_s23, 512  }
  0x2d   : > { %476 = vsyncadd (%p568_p8), %s141_s23, 4294966784  ;;  %v173_v0 = vld [vmem:[%s144_s24 + $0x10] sm:$0xff]  ;;  %v171_v1 = vld [vmem:[%s144_s24] sm:$0xff]  ;;  %s324_s25 = sshll.u32 %s603_s17, 1  ;;  %vm169_vm0 = vcmask 123904   ;;  %v509_v4 = vmov 0.0   ;;  %v188_v5 = vlaneseq }
  0x2e   : > { %180 = vadd.xlane.f32.xlu1 %v173_v0  ;;  %176 = vadd.xlane.f32.xlu0 %v171_v1  ;;  %v174_v2 = vld [vmem:[%s144_s24 + $0x18] sm:$0xff]  ;;  %v172_v3 = vld [vmem:[%s144_s24 + $0x8] sm:$0xff]  ;;  %s162_s26 = scalar_lea.vmem [#allocation5], %s324_s25  ;;  %vm199_vm1 = vcmask 130112   ;;  %vm210_vm2 = vcmask 1041409   ;;  %s326_s18 = sshll.u32 %s495_s9, 5 }
  0x2f   : > { %170 = vst.msk [vmem:[%s162_s26] sm:$0x3] %vm169_vm0, %v509_v4  ;;  %v189_v6 = vand.u32 127, %v188_v5  ;;  %v191_v7 = vshrl.u32 %v188_v5, 7  ;;  %s231_s27 = sshll.u32 %s162_s26, 4  ;;  %s229_s30 = scalar_lea.hbm %s655_s1, %s326_s18  ;;  %s232_s27 = int_to_ptr.vmem [resolvable:$true] %s231_s27 }
  0x30   : > { %s217_s2 = scalar_lea.sflag [#allocation4], %s603_s17  ;;  %s423_s3 = scalar_lea.vmem %s232_s27, 32 }
  0x31   : > { %v194_v8 = vadd.s32 4294967288, %v189_v6  ;;  %v192_v11 = vsub.s32 %v189_v6, %v191_v7  ;;  %p424_p8 = scmp.ne.s32.totalorder %s232_s27, %s423_s3  ;;  %s510_s4 = smov [#allocation5]  }
  0x32   : > { %182 = vadd.xlane.f32.xlu1 %v174_v2  ;;  %178 = vadd.xlane.f32.xlu0 %v172_v3  ;;  %s427_s9 = sshll.u32 %s510_s4, 4  ;;  %s428_s9 = int_to_ptr.vmem [resolvable:$false] %s427_s9 }
  0x33   : > { %v197_v12 = vsub.s32 %v194_v8, %v191_v7  ;;  %p425_p12 = pnand %p424_p8, %p572_p9  ;;  %s429_s5 = scalar_lea.vmem %s428_s9, 64 }
  0x34   : > { %p430_p2 = scmp.lt.s32.totalorder %s232_s27, %s428_s9  ;;  %p431_p3 = scmp.lt.s32.totalorder %s429_s5, %s423_s3 }
  0x35   : > { %p426_p0 = pneg %p425_p12 }
  0x36   : > { %v175_v19 = vld [vmem:[%s162_s26] sm:$0x3]  ;;  %p432_p5 = por %p431_p3, %p430_p2 }
  0x38   : > { %p433_p6 = pnand %p432_p5, %p426_p0 }
  0xb7   : > { %v181_v9 = vpop.xlane.xlu1 %180  ;;  %v177_v10 = vpop.xlane.xlu0 %176 }
  0xb8   : > { %v204_v15 = vrot.slane %v181_v9, %v192_v11  ;;  %v193_v16 = vrot.slane %v177_v10, %v192_v11 }
  0xbb   : > { %v183_v13 = vpop.xlane.xlu1 %182  ;;  %v179_v14 = vpop.xlane.xlu0 %178 }
  0xbc   : > { %v208_v17 = vrot.slane %v183_v13, %v197_v12  ;;  %v198_v18 = vrot.slane %v179_v14, %v197_v12 }
  0xbe   : > { %v209_v20 = vsel %vm199_vm1, %v208_v17, %v204_v15  ;;  %v200_v21 = vsel %vm199_vm1, %v198_v18, %v193_v16 }
  0xbf   : > { %v211_v22 = vsel %vm210_vm2, %v209_v20, %v200_v21 }
  0xc0   : > { %v213_v23 = vadd.f32 %v211_v22, %v175_v19 }
  0xc2   : > { %215 = vst.msk [vmem:[%s162_s26] sm:$0x3] %vm169_vm0, %v213_v23 }
  0xc3   : > { %436 = shalt.err (!%p433_p6)
}
  0xc4   : > { %s437_s12 = scalar_lea.hbm %s229_s30, 32  ;;  %s441_s16 = scalar_lea.hbm %s655_s1, 64 }
  0xc5   : > { %p438_p7 = scmp.ne.s32.totalorder %s229_s30, %s437_s12  ;;  %p442_p13 = scmp.lt.s32.totalorder %s229_s30, %s655_s1 }
  0xc6   : > { %p443_p1 = scmp.lt.s32.totalorder %s441_s16, %s437_s12 }
  0xc7   : > { %p439_p10 = pnand %p438_p7, %p572_p9 }
  0xc8   : > { %p444_p8 = por %p443_p1, %p442_p13 }
  0xc9   : > { %p440_p4 = pneg %p439_p10 }
  0xcb   : > { %p445_p12 = pnand %p444_p8, %p440_p4 }
  0xcd   : > { %448 = shalt.err (!%p445_p12)
}
  0xce   : > { %331 = dma.vmem_to_hbm [thread:$0]  (%p572_p9), %s232_s27, 32, %s229_s30, %s217_s2  }
  0xcf PF: > { %s243_s23 = sand.u32 1, %s483_s6   ;;  %p661_p0 = scmp.ge.s32.totalorder %s503_s11, 2 }
  0xd0   : > { %s244_s24 = scalar_lea.sflag [#allocation4], %s243_s23 }
  0xd1   : > { %p338_p2 = pnand %p661_p0, %p579_p11 }
  0xd3   : > { %p339_p3 = pneg %p338_p2 }
  0xd5   : > { %478 = dma.done.wait (%p339_p3), %s244_s24, 32  }
  0xd6   : > { %480 = vsyncadd (%p339_p3), %s244_s24, 4294967264  ;;  %s17_s11 = sadd.s32 1, %s503_s11   ;;  %s662_s6 = smov %s487_s7 }
  0xd7   : > { %p14_p5 = scmp.ge.s32.totalorder %s17_s11, 4   ;;  %s663_s7 = smov %s491_s8 }
  0xd8   : > { %s664_s8 = smov %s577_s20  ;;  %s665_s9 = smov %s499_s10 }
  0xd9   : > { %s666_s10 = smov %s668_s14  ;;  %16 = sbr.rel (!%p14_p5) target bundleno = 6 (0x6), region = 73 }
  0xde   :  { %249 = vsyncpa [#allocation3], 1 }
  0xdf   :  { %251 = vsyncpa [#allocation3 + $0x1], 1 }
  0xe0   :  { %252 = vsyncpa [#allocation4], 1 }
  0xe1   :  { %254 = vsyncpa [#allocation4 + $0x1], 1 }

</bundles_post_ra>
